<compile_context>
chip_gen: v5e
topology: v5e:2x2
jax: 0.10.0
libtpu: 0.0.40
codegen_flags: <defaults>
</compile_context>

<pallas_src>
import functools

import jax
import jax.numpy as jnp
from jax.experimental import pallas as pl
from jax.experimental.pallas import tpu as pltpu


def make_divisible(v, divisor=8, min_value=None, min_ratio=0.0):
    # timm-style make_divisible with min_ratio=0.0 (no 90% floor enforcement).
    if min_value is None:
        min_value = divisor
    new_v = max(min_value, int(v + divisor / 2) // divisor * divisor)
    if new_v < min_ratio * v:
        new_v += divisor
    return new_v


def _choose_hw_tile(hw, c, itemsize, target_bytes):
    """Multiple-of-128 HW tile sized to ~target_bytes per (C, T) block.
    Used with grid = pl.cdiv(HW, T); the trailing partial tile is masked
    explicitly in the mean pass and edge-clipped by Pallas in the scale pass."""
    assert hw >= 128, "small spatial extents always take the fused path"
    t_cap = max(128, (target_bytes // max(1, c * itemsize)) // 128 * 128)
    t_max = (hw // 128) * 128
    return max(128, min(t_cap, t_max))


def _column_gate(m_col, w1_ref, b1_ref, w2_ref, b2_ref):
    """m_col: (C, 1) f32 channel means -> (C, 1) f32 sigmoid gate.
    Column-vector FCs keep C on sublanes (no lane<->sublane relayout)."""
    h = jnp.dot(w1_ref[...], m_col, preferred_element_type=jnp.float32)
    h = jnp.maximum(h + b1_ref[...], 0.0)                                # (R, 1)
    g = jnp.dot(w2_ref[...], h, preferred_element_type=jnp.float32)
    return jax.nn.sigmoid(g + b2_ref[...])                               # (C, 1)


def _fused_kernel(x_ref, w1_ref, b1_ref, w2_ref, b2_ref, o_ref, *, inv_hw):
    # x_ref: (1, C, HW) — the whole image stays resident in VMEM.
    x = x_ref[...]
    m = jnp.sum(x.astype(jnp.float32), axis=-1, keepdims=True) * inv_hw  # (1,C,1)
    g = _column_gate(m[0], w1_ref, b1_ref, w2_ref, b2_ref)               # (C,1)
    gate = g.reshape(1, g.shape[0], 1).astype(x.dtype)                   # (1,C,1)
    o_ref[...] = (x * gate).astype(o_ref.dtype)


def _mean_gate_kernel(x_ref, w1_ref, b1_ref, w2_ref, b2_ref, g_ref, acc_ref,
                      *, hw, tile, inv_hw):
    # x_ref: (1, C, tile); acc_ref: (1, C, 128) f32 lane-shaped accumulator.
    t = pl.program_id(1)

    @pl.when(t == 0)
    def _():
        acc_ref[...] = jnp.zeros_like(acc_ref)

    xf = x_ref[...].astype(jnp.float32)
    if hw % tile != 0:
        # Masked tail: the trailing partial block reads unspecified lanes.
        lane = jax.lax.broadcasted_iota(jnp.int32, xf.shape, 2)
        xf = jnp.where(lane < (hw - t * tile), xf, 0.0)

    # Lane-grouped accumulation: pure elementwise VPU adds in the steady
    # state; the single cross-lane reduce is deferred to the epilogue.
    partial = xf[:, :, 0:128]
    for gi in range(1, tile // 128):
        partial = partial + xf[:, :, gi * 128:(gi + 1) * 128]
    acc_ref[...] += partial

    @pl.when(t == pl.num_programs(1) - 1)
    def _():
        m = jnp.sum(acc_ref[...], axis=-1, keepdims=True)[0] * inv_hw    # (C,1)
        g = _column_gate(m, w1_ref, b1_ref, w2_ref, b2_ref)              # (C,1)
        g_ref[...] = g.reshape(1, g.shape[0], 1).astype(g_ref.dtype)


def _scale_kernel(x_ref, g_ref, o_ref):
    # x_ref: (1, C, tile); g_ref: (1, C, 1) per-channel gate, lane-broadcast.
    # Native-dtype multiply (bf16 stays bf16 on v6e/v7x).
    o_ref[...] = (x_ref[...] * g_ref[...]).astype(o_ref.dtype)


def squeeze_excite_pallas(x_nchw, w1, b1, w2, b2, *,
                          fused_block_cap_bytes=8 << 20,
                          tile_target_bytes=2 << 20):
    """SqueezeExcite forward.

    x_nchw: (B, C, H, W)
    w1: (R, C) fc1 1x1-conv weight (out, in); b1: (R,)
    w2: (C, R) fc2 1x1-conv weight (out, in); b2: (C,)
    """
    B, C, H, W = x_nchw.shape
    R = w1.shape[0]
    HW = H * W
    x = x_nchw.reshape(B, C, HW)                 # free view of contiguous NCHW

    # FC parameters as f32 column-vector operands (tiny; FC math stays f32).
    w1f = w1.astype(jnp.float32)                 # (R, C)
    w2f = w2.astype(jnp.float32)                 # (C, R)
    b1c = b1.reshape(R, 1).astype(jnp.float32)
    b2c = b2.reshape(C, 1).astype(jnp.float32)
    weight_bytes = 4 * (w1f.size + w2f.size + b1c.size + b2c.size)

    itemsize = x.dtype.itemsize
    block_bytes = C * HW * itemsize
    inv_hw = 1.0 / HW

    def _vmem_limit(nbytes):
        # Explicit scoped-VMEM budget: >= actual working set, capped well
        # under the v7x 64 MiB physical ceiling (v5e/v6e have 128 MiB).
        return int(min(max(nbytes, 16 << 20), 48 << 20))

    # ---- Fused single-pass path: x read once, written once. ----------------
    # TODO(synk): for B == 1 on v7x this uses one TensorCore; a dual-core
    # HW-split of the reduction (per-core partial sums) is not implemented.
    if block_bytes <= fused_block_cap_bytes or HW < 128:
        vmem = _vmem_limit(4 * block_bytes + 2 * weight_bytes + (4 << 20))
        out = pl.pallas_call(
            functools.partial(_fused_kernel, inv_hw=inv_hw),
            out_shape=jax.ShapeDtypeStruct((B, C, HW), x.dtype),
            grid_spec=pltpu.PrefetchScalarGridSpec(
                num_scalar_prefetch=0,
                grid=(B,),
                in_specs=[
                    pl.BlockSpec((1, C, HW), lambda b: (b, 0, 0)),
                    pl.BlockSpec((R, C), lambda b: (0, 0)),
                    pl.BlockSpec((R, 1), lambda b: (0, 0)),
                    pl.BlockSpec((C, R), lambda b: (0, 0)),
                    pl.BlockSpec((C, 1), lambda b: (0, 0)),
                ],
                out_specs=pl.BlockSpec((1, C, HW), lambda b: (b, 0, 0)),
            ),
            compiler_params=pltpu.CompilerParams(
                dimension_semantics=("parallel",),
                vmem_limit_bytes=vmem),
        )(x, w1f, b1c, w2f, b2c)
        return out.reshape(B, C, H, W)

    # ---- Fallback for large C*HW: two tiled passes. -------------------------
    T = _choose_hw_tile(HW, C, itemsize, tile_target_bytes)
    n_t = pl.cdiv(HW, T)
    tile_bytes = C * T * itemsize

    # Pass A: tiled mean over HW with the gate computed in the epilogue.
    vmem_a = _vmem_limit(2 * tile_bytes + C * 128 * 4 + 2 * weight_bytes
                         + 2 * C * itemsize + (2 << 20))
    gate = pl.pallas_call(
        functools.partial(_mean_gate_kernel, hw=HW, tile=T, inv_hw=inv_hw),
        out_shape=jax.ShapeDtypeStruct((B, C, 1), x.dtype),
        grid_spec=pltpu.PrefetchScalarGridSpec(
            num_scalar_prefetch=0,
            grid=(B, n_t),
            in_specs=[
                pl.BlockSpec((1, C, T), lambda b, t: (b, 0, t)),
                pl.BlockSpec((R, C), lambda b, t: (0, 0)),
                pl.BlockSpec((R, 1), lambda b, t: (0, 0)),
                pl.BlockSpec((C, R), lambda b, t: (0, 0)),
                pl.BlockSpec((C, 1), lambda b, t: (0, 0)),
            ],
            out_specs=pl.BlockSpec((1, C, 1), lambda b, t: (b, 0, 0)),
            scratch_shapes=[pltpu.VMEM((1, C, 128), jnp.float32)],
        ),
        compiler_params=pltpu.CompilerParams(
            dimension_semantics=("parallel", "arbitrary"),
            vmem_limit_bytes=vmem_a),
    )(x, w1f, b1c, w2f, b2c)

    # Pass B: tiled broadcast multiply (x read once, y written once).
    vmem_b = _vmem_limit(4 * tile_bytes + 2 * C * itemsize + (2 << 20))
    out = pl.pallas_call(
        _scale_kernel,
        out_shape=jax.ShapeDtypeStruct((B, C, HW), x.dtype),
        grid_spec=pltpu.PrefetchScalarGridSpec(
            num_scalar_prefetch=0,
            grid=(B, n_t),
            in_specs=[
                pl.BlockSpec((1, C, T), lambda b, t: (b, 0, t)),
                pl.BlockSpec((1, C, 1), lambda b, t: (b, 0, 0)),
            ],
            out_specs=pl.BlockSpec((1, C, T), lambda b, t: (b, 0, t)),
        ),
        compiler_params=pltpu.CompilerParams(
            dimension_semantics=("parallel", "parallel"),
            vmem_limit_bytes=vmem_b),
    )(x, gate)
    return out.reshape(B, C, H, W)


def squeeze_excite_reference(x_nchw, w1, b1, w2, b2):
    se = jnp.mean(x_nchw.astype(jnp.float32), axis=(2, 3))               # (B, C)
    h = jnp.maximum(se @ w1.T + b1, 0.0)                                 # (B, R)
    g = jax.nn.sigmoid(h @ w2.T + b2)                                    # (B, C)
    return (x_nchw.astype(jnp.float32) * g[:, :, None, None]).astype(x_nchw.dtype)


if __name__ == "__main__":
    def run_case(B, C, H, W, **kwargs):
        R = make_divisible(C * (1.0 / 16), 8, min_ratio=0.0)
        key = jax.random.PRNGKey(0)
        kx, k1, k2, k3, k4 = jax.random.split(key, 5)
        x = jax.random.normal(kx, (B, C, H, W), dtype=jnp.float32)
        w1 = jax.random.normal(k1, (R, C), dtype=jnp.float32) * 0.1   # fc1 (out,in)
        b1 = jax.random.normal(k2, (R,), dtype=jnp.float32) * 0.1
        w2 = jax.random.normal(k3, (C, R), dtype=jnp.float32) * 0.1   # fc2 (out,in)
        b2 = jax.random.normal(k4, (C,), dtype=jnp.float32) * 0.1
        y = jax.block_until_ready(squeeze_excite_pallas(x, w1, b1, w2, b2, **kwargs))
        y_ref = squeeze_excite_reference(x, w1, b1, w2, b2)
        assert jnp.allclose(y, y_ref, atol=1e-5, rtol=1e-5), \
            f"mismatch vs reference for shape {(B, C, H, W)}"

    # 1) Fused resident-block path (typical SE-layer footprint).
    run_case(2, 64, 16, 16)
    # 2) Tiled fallback path, forced at a small shape: exercises the cdiv grid,
    #    masked tail (196 % 128 != 0) and the epilogue-folded gate.
    run_case(2, 32, 14, 14, fused_block_cap_bytes=0, tile_target_bytes=16 << 10)

    print("KERNEL_OK")
</pallas_src>

<mosaic_0001>
module attributes {stable_mosaic.version = 11 : i64} {
  func.func @_fused_kernel(%arg0: i32, %arg1: memref<1x64x256xf32, #tpu.memory_space<vmem>>, %arg2: memref<8x64xf32, #tpu.memory_space<vmem>>, %arg3: memref<8x1xf32, #tpu.memory_space<vmem>>, %arg4: memref<64x8xf32, #tpu.memory_space<vmem>>, %arg5: memref<64x1xf32, #tpu.memory_space<vmem>>, %arg6: memref<1x64x256xf32, #tpu.memory_space<vmem>>) attributes {dimension_semantics = [#tpu.dimension_semantics<parallel>], iteration_bounds = array<i64: 2>, scalar_prefetch = 0 : i64, scratch_operands = 0 : i64, tpu.core_type = #tpu.core_type<tc>, window_params = [{transform_indices = @transform_0, window_bounds = array<i64: 1, 64, 256>}, {pipeline_mode = #tpu.pipeline_mode<synchronous>, transform_indices = @transform_1, window_bounds = array<i64: 8, 64>}, {pipeline_mode = #tpu.pipeline_mode<synchronous>, transform_indices = @transform_2, window_bounds = array<i64: 8, 1>}, {pipeline_mode = #tpu.pipeline_mode<synchronous>, transform_indices = @transform_3, window_bounds = array<i64: 64, 8>}, {pipeline_mode = #tpu.pipeline_mode<synchronous>, transform_indices = @transform_4, window_bounds = array<i64: 64, 1>}, {transform_indices = @transform_5, window_bounds = array<i64: 1, 64, 256>}]} {
    %c0 = arith.constant 0 : index
    %c0_0 = arith.constant 0 : index
    %c0_1 = arith.constant 0 : index
    %0 = vector.load %arg1[%c0, %c0_0, %c0_1] : memref<1x64x256xf32, #tpu.memory_space<vmem>>, vector<1x64x256xf32>
    %cst = arith.constant dense<0.000000e+00> : vector<1x64xf32>
    %1 = vector.multi_reduction <add>, %0, %cst [2] : vector<1x64x256xf32> to vector<1x64xf32>
    %2 = vector.shape_cast %1 : vector<1x64xf32> to vector<1x64x1xf32>
    %cst_2 = arith.constant 3.906250e-03 : f32
    %3 = vector.broadcast %cst_2 : f32 to vector<1x64x1xf32>
    %4 = arith.mulf %2, %3 : vector<1x64x1xf32>
    %5 = vector.shape_cast %4 : vector<1x64x1xf32> to vector<64x1xf32>
    %c0_3 = arith.constant 0 : index
    %c0_4 = arith.constant 0 : index
    %6 = vector.load %arg2[%c0_3, %c0_4] : memref<8x64xf32, #tpu.memory_space<vmem>>, vector<8x64xf32>
    %cst_5 = arith.constant dense<0.000000e+00> : vector<8x1xf32>
    %7 = tpu.matmul %6, %5, %cst_5 {dimension_numbers = #tpu.dot_dimension_numbers<[1], [0], [0], [1], [0, 0, 1, 1], [], []>} : vector<8x64xf32>, vector<64x1xf32>, vector<8x1xf32> -> vector<8x1xf32>
    %c0_6 = arith.constant 0 : index
    %c0_7 = arith.constant 0 : index
    %8 = vector.load %arg3[%c0_6, %c0_7] : memref<8x1xf32, #tpu.memory_space<vmem>>, vector<8x1xf32>
    %9 = arith.addf %7, %8 : vector<8x1xf32>
    %cst_8 = arith.constant 0.000000e+00 : f32
    %10 = vector.broadcast %cst_8 : f32 to vector<8x1xf32>
    %11 = arith.maximumf %9, %10 : vector<8x1xf32>
    %c0_9 = arith.constant 0 : index
    %c0_10 = arith.constant 0 : index
    %12 = vector.load %arg4[%c0_9, %c0_10] : memref<64x8xf32, #tpu.memory_space<vmem>>, vector<64x8xf32>
    %cst_11 = arith.constant dense<0.000000e+00> : vector<64x1xf32>
    %13 = tpu.matmul %12, %11, %cst_11 {dimension_numbers = #tpu.dot_dimension_numbers<[1], [0], [0], [1], [0, 0, 1, 1], [], []>} : vector<64x8xf32>, vector<8x1xf32>, vector<64x1xf32> -> vector<64x1xf32>
    %c0_12 = arith.constant 0 : index
    %c0_13 = arith.constant 0 : index
    %14 = vector.load %arg5[%c0_12, %c0_13] : memref<64x1xf32, #tpu.memory_space<vmem>>, vector<64x1xf32>
    %15 = arith.addf %13, %14 : vector<64x1xf32>
    %16 = arith.negf %15 : vector<64x1xf32>
    %17 = math.exp %16 : vector<64x1xf32>
    %cst_14 = arith.constant 1.000000e+00 : f32
    %18 = vector.broadcast %cst_14 : f32 to vector<64x1xf32>
    %19 = arith.addf %18, %17 : vector<64x1xf32>
    %20 = arith.divf %18, %19 : vector<64x1xf32>
    %21 = vector.shape_cast %20 : vector<64x1xf32> to vector<1x64x1xf32>
    %22 = vector.broadcast %21 : vector<1x64x1xf32> to vector<1x64x256xf32>
    %23 = arith.mulf %0, %22 : vector<1x64x256xf32>
    %c0_15 = arith.constant 0 : index
    %c0_16 = arith.constant 0 : index
    %c0_17 = arith.constant 0 : index
    %24 = vector.load %arg6[%c0_15, %c0_16, %c0_17] : memref<1x64x256xf32, #tpu.memory_space<vmem>>, vector<1x64x256xf32>
    tpu.vector_store %arg6[%c0_15, %c0_16, %c0_17], %23 {strides = array<i32>} : memref<1x64x256xf32, #tpu.memory_space<vmem>>, vector<1x64x256xf32>,
    return
  }
  func.func @transform_0(%arg0: i32) -> (i32, i32, i32) {
    %c0_i32 = arith.constant 0 : i32
    %c0_i32_0 = arith.constant 0 : i32
    %c0_i32_1 = arith.constant 0 : i32
    return %arg0, %c0_i32, %c0_i32_0 : i32, i32, i32
  }
  func.func @transform_1(%arg0: i32) -> (i32, i32) {
    %c0_i32 = arith.constant 0 : i32
    %c0_i32_0 = arith.constant 0 : i32
    %c0_i32_1 = arith.constant 0 : i32
    return %c0_i32, %c0_i32_0 : i32, i32
  }
  func.func @transform_2(%arg0: i32) -> (i32, i32) {
    %c0_i32 = arith.constant 0 : i32
    %c0_i32_0 = arith.constant 0 : i32
    %c0_i32_1 = arith.constant 0 : i32
    return %c0_i32, %c0_i32_0 : i32, i32
  }
  func.func @transform_3(%arg0: i32) -> (i32, i32) {
    %c0_i32 = arith.constant 0 : i32
    %c0_i32_0 = arith.constant 0 : i32
    %c0_i32_1 = arith.constant 0 : i32
    return %c0_i32, %c0_i32_0 : i32, i32
  }
  func.func @transform_4(%arg0: i32) -> (i32, i32) {
    %c0_i32 = arith.constant 0 : i32
    %c0_i32_0 = arith.constant 0 : i32
    %c0_i32_1 = arith.constant 0 : i32
    return %c0_i32, %c0_i32_0 : i32, i32
  }
  func.func @transform_5(%arg0: i32) -> (i32, i32, i32) {
    %c0_i32 = arith.constant 0 : i32
    %c0_i32_0 = arith.constant 0 : i32
    %c0_i32_1 = arith.constant 0 : i32
    return %arg0, %c0_i32, %c0_i32_0 : i32, i32, i32
  }
}

</mosaic_0001>

<bundles_post_ra>
// kernel: tpu_custom_call.1
= control target key start
LH: loop header
LB: loop body
LE: loop exit
PB: predicated region body
PF: predicated region fallthrough
CT: control target
= control target key end

     0   :  { %10 = vsyncpa [#allocation3], 0  ;;  %s1309_s0 = inlined_call_operand.hbm [shape: f32[2,64,256], index: 0, kind: input, shape index: {}]   ;;  %s1310_s1 = inlined_call_operand.vmem [shape: f32[8,64], index: 1, kind: input, shape index: {}]   ;;  %s1311_s2 = inlined_call_operand.vmem [shape: f32[8,1], index: 2, kind: input, shape index: {}]   ;;  %s1312_s3 = inlined_call_operand.vmem [shape: f32[64,8], index: 3, kind: input, shape index: {}]   ;;  %s1313_s4 = inlined_call_operand.vmem [shape: f32[64,1], index: 4, kind: input, shape index: {}]   ;;  %s1314_s5 = inlined_call_operand.hbm [shape: f32[2,64,256], index: 5, kind: output, shape index: {}]  }
   0x1   :  { %12 = vsyncpa [#allocation3 + $0x1], 0 }
   0x2   :  { %13 = vsyncpa [#allocation4], 0 }
   0x3   :  { %15 = vsyncpa [#allocation4 + $0x1], 0  ;;  %s969_s18 = smov 0   ;;  %s971_s19 = smov 0  }
   0x4   :  { %s973_s20 = smov 0   ;;  %s975_s21 = smov 0  }
   0x5 LB: > { %s990_s22 = sadd.s32 4294967295, %s932_s21   ;;  %s715_s23 = sadd.s32 4294967294, %s932_s21   ;;  %s932_s21 = sphi %s975_s21, %s1326_s21   ;;  %s928_s20 = sphi %s973_s20, %s1325_s20   ;;  %s924_s19 = sphi %s971_s19, %s1324_s19   ;;  %s920_s18 = sphi %s969_s18, %s1323_s18  }
   0x6   : > { %s994_s24 = sadd.s32 1, %s932_s21   ;;  %s28_s25 = sadd.s32 1, %s928_s20 }
   0x7   : > { %s25_s26 = ssub.s32 %s932_s21, %s994_s24  ;;  %p35_p0 = scmp.ne.s32.totalorder %s928_s20, %s924_s19 }
   0x8   : > { %p26_p1 = scmp.eq.s32.totalorder %s25_s26, 0  ;;  %p36_p2 = scmp.eq.s32.totalorder %s932_s21, 0 }
   0x9   : > { %p41_p3 = scmp.ne.s32.totalorder %s924_s19, %s920_s18  ;;  %p42_p4 = scmp.eq.s32.totalorder %s990_s22, 0 }
   0xa   : > { %s1006_s27 = scalar_select %p26_p1, %s928_s20, %s28_s25  }
   0xb   : > { %p1008_p5 = por %p36_p2, %p35_p0  ;;  %p1012_p6 = por %p42_p4, %p41_p3 }
   0xc   : > { %p149_p7 = scmp.eq.s32.totalorder %s990_s22, 1  ;;  %p155_p8 = scmp.eq.s32.totalorder %s715_s23, 1 }
   0xd   : > { %p762_p10 = scmp.lt.s32.totalorder %s932_s21, 2  ;;  %s187_s7 = sand.u32 1, %s928_s20  }
   0xe   : > { %p1019_p11 = por %p149_p7, %p35_p0  ;;  %p1023_p12 = por %p155_p8, %p41_p3 }
   0xf   : > { %s746_s8 = sshll.u32 %s932_s21, 7  ;;  %s718_s9 = sshll.u32 %s187_s7, 7 }
  0x10   : > { %s196_s12 = scalar_lea.hbm %s1309_s0, %s746_s8  ;;  %s191_s14 = scalar_lea.vmem [#allocation2], %s718_s9 }
  0x11   : > { %s197_s13 = sshll.u32 %s196_s12, 4  ;;  %s199_s15 = sshll.u32 %s191_s14, 4  ;;  %s198_s13 = int_to_ptr.hbm [resolvable:$true] %s197_s13  ;;  %s200_s15 = int_to_ptr.vmem [resolvable:$true] %s199_s15 }
  0x12   : > { %p1034_p13 = pnand %p762_p10, %p1008_p5  ;;  %p721_p0 = scmp.ge.s32.totalorder %s932_s21, 1 }
  0x13   : > { %p207_p1 = scmp.lt.s32.totalorder %s932_s21, 3  ;;  %s188_s17 = scalar_lea.sflag [#allocation3], %s187_s7 }
  0x14   : > { %s836_s23 = sshra.s32 %s198_s13, 4  ;;  %p840_p3 = pneg %p1034_p13  ;;  %s837_s23 = int_to_ptr.hbm [resolvable:$true] %s836_s23 }
  0x15   : > { %s838_s25 = scalar_lea.hbm %s837_s23, 128  ;;  %s843_s28 = scalar_lea.hbm %s1309_s0, 256 }
  0x16   : > { %p839_p2 = scmp.ne.s32.totalorder %s837_s23, %s838_s25  ;;  %p844_p5 = scmp.lt.s32.totalorder %s837_s23, %s1309_s0 }
  0x17   : > { %p845_p8 = scmp.lt.s32.totalorder %s843_s28, %s838_s25 }
  0x18   : > { %p841_p4 = pnand %p840_p3, %p839_p2 }
  0x19   : > { %p846_p10 = por %p845_p8, %p844_p5 }
  0x1a   : > { %p842_p7 = pneg %p841_p4 }
  0x1c   : > { %p847_p9 = pnand %p846_p10, %p842_p7 }
  0x1e   : > { %850 = shalt.err (!%p847_p9)
}
  0x1f   : > { %s934_s7 = smov 256   ;;  %s935_s11 = smov 16  }
  0x20   : > { %757 = dma.hbm_to_vmem [thread:$0]  (!%p1034_p13), %s198_s13, 2048, %s200_s15, %s188_s17, %s934_s7, %s934_s7, %s935_s11  }
  0x21   : > { %p208_p2 = pnand %p721_p0, %p207_p1 }
  0x22   : > { %s1055_s12 = sand.u32 (!%p208_p2), 1, %s924_s19  }
  0x23   : > { %211 = sbr.rel (%p208_p2) target bundleno = 626 (0x272), region = 40  ;;  %s722_s14 = sshll.u32 (!%p208_p2), %s1055_s12, 7 }
  0x24   : > { %s214_s23 = scalar_lea.sflag (!%p208_p2), [#allocation3], %s1055_s12  ;;  %s217_s25 = scalar_lea.vmem (!%p208_p2), [#allocation2], %s722_s14 }
  0x28   : > { %911 = dma.done.wait (%p1012_p6), %s214_s23, 2048  }
  0x29   : > { %913 = vsyncadd (%p1012_p6), %s214_s23, 4294965248  ;;  %v1065_v0 = vld [vmem:[%s217_s25 + $0x70] sm:$0xff]  ;;  %v1067_v1 = vld [vmem:[%s217_s25 + $0x78] sm:$0xff]  ;;  %vm295_vm0 = vcmask 523264   ;;  %vm336_vm1 = vcmask 64512   ;;  %v936_v55 = vmov 0  }
  0x2a   : > { %v1069_v2 = vld [vmem:[%s217_s25 + $0x50] sm:$0xff]  ;;  %v282_v3 = vadd.f32 %v1067_v1, %v1065_v0  ;;  %v1073_v4 = vld [vmem:[%s217_s25 + $0x58] sm:$0xff]  ;;  %v1083_v9 = vld [vmem:[%s217_s25 + $0x60] sm:$0xff]  ;;  %801 = vset.pattern.permute.xlu2 %v936_v55  ;;  %802 = vset.pattern.permute.xlu0 %v936_v55  ;;  %s1243_s9 = scalar_lea.vmem [#allocation5], %s722_s14  ;;  %s747_s14 = sshll.u32 %s990_s22, 7 }
  0x2b   : > { %v276_v5 = vadd.f32 %v1073_v4, %v1069_v2  ;;  %v1077_v6 = vld [vmem:[%s217_s25 + $0x30] sm:$0xff]  ;;  %v1079_v7 = vld [vmem:[%s217_s25 + $0x38] sm:$0xff]  ;;  %v1085_v10 = vld [vmem:[%s217_s25 + $0x68] sm:$0xff]  ;;  %803 = vset.pattern.permute.xlu1 %v936_v55  ;;  %s638_s11 = scalar_lea.hbm %s1314_s5, %s747_s14  ;;  %s639_s23 = sshll.u32 %s1243_s9, 4  ;;  %s640_s23 = int_to_ptr.vmem [resolvable:$true] %s639_s23 }
  0x2c   : > { %283 = vadd.xlane.f32.xlu0 %v282_v3  ;;  %v270_v8 = vadd.f32 %v1079_v7, %v1077_v6  ;;  %v1087_v11 = vld [vmem:[%s217_s25 + $0x40] sm:$0xff]  ;;  %v1089_v12 = vld [vmem:[%s217_s25 + $0x48] sm:$0xff]  ;;  %v279_v15 = vadd.f32 %v1085_v10, %v1083_v9  ;;  %v1101_v18 = vld [vmem:[%s217_s25 + $0x10] sm:$0xff]  ;;  %s627_s22 = scalar_lea.sflag [#allocation4], %s1055_s12  ;;  %s886_s17 = scalar_lea.hbm %s1314_s5, 256 }
  0x2d   : > { %277 = vadd.xlane.f32.xlu1 %v276_v5  ;;  %v1091_v13 = vld [vmem:[%s217_s25 + $0x20] sm:$0xff]  ;;  %v1093_v14 = vld [vmem:[%s217_s25 + $0x28] sm:$0xff]  ;;  %v273_v16 = vadd.f32 %v1089_v12, %v1087_v11  ;;  %v1103_v19 = vld [vmem:[%s217_s25 + $0x18] sm:$0xff] }
  0x2e   : > { %271 = vadd.xlane.f32.xlu2 %v270_v8  ;;  %v267_v17 = vadd.f32 %v1093_v14, %v1091_v13  ;;  %v1105_v20 = vld [vmem:[%s217_s25] sm:$0xff]  ;;  %v1107_v21 = vld [vmem:[%s217_s25 + $0x8] sm:$0xff]  ;;  %v264_v22 = vadd.f32 %v1103_v19, %v1101_v18  ;;  %v323_v46 = vld [vmem:[%s1312_s3 + $0x18] sm:$0xff]  ;;  %s641_s25 = sshll.u32 %s638_s11, 4  ;;  %s642_s25 = int_to_ptr.hbm [resolvable:$true] %s641_s25 }
  0x2f   : > { %v261_v23 = vadd.f32 %v1107_v21, %v1105_v20  ;;  %v293_v40 = vld [vmem:[%s1310_s1] sm:$0xff]  ;;  %v326_v47 = vld [vmem:[%s1312_s3 + $0x30] sm:$0xff]  ;;  %v321_v48 = vld [vmem:[%s1312_s3 + $0x8] sm:$0xff]  ;;  %s880_s29 = sshra.s32 %s642_s25, 4  ;;  %s881_s29 = int_to_ptr.hbm [resolvable:$true] %s880_s29 }
  0x30   : > { %v294_v41 = vld [vmem:[%s1311_s2] sm:$0xff]  ;;  %v327_v50 = vld [vmem:[%s1312_s3 + $0x38] sm:$0xff]  ;;  %v322_v51 = vld [vmem:[%s1312_s3 + $0x10] sm:$0xff]  ;;  %s882_s13 = scalar_lea.hbm %s881_s29, 128  ;;  %p887_p0 = scmp.lt.s32.totalorder %s881_s29, %s1314_s5 }
  0x31   : > { %v320_v45 = vld [vmem:[%s1312_s3] sm:$0xff]  ;;  %v325_v52 = vld [vmem:[%s1312_s3 + $0x28] sm:$0xff]  ;;  %v331_v58 = vld [vmem:[%s1313_s4 + $0x18] sm:$0xff]  ;;  %p883_p6 = scmp.ne.s32.totalorder %s881_s29, %s882_s13  ;;  %p888_p1 = scmp.lt.s32.totalorder %s886_s17, %s882_s13 }
  0x32   : > { %v324_v49 = vld [vmem:[%s1312_s3 + $0x20] sm:$0xff]  ;;  %v334_v59 = vld [vmem:[%s1313_s4 + $0x30] sm:$0xff]  ;;  %v329_v60 = vld [vmem:[%s1313_s4 + $0x8] sm:$0xff] }
  0x33   : > { %v328_v53 = vld [vmem:[%s1313_s4] sm:$0xff]  ;;  %p884_p9 = pnand %p883_p6, %p1019_p11  ;;  %p889_p3 = por %p888_p1, %p887_p0 }
  0x34   : > { %280 = vadd.xlane.f32.xlu0 %v279_v15 }
  0x35   : > { %274 = vadd.xlane.f32.xlu1 %v273_v16  ;;  %p885_p13 = pneg %p884_p9 }
  0x36   : > { %268 = vadd.xlane.f32.xlu2 %v267_v17 }
  0x37   : > { %p890_p4 = pnand %p889_p3, %p885_p13 }
  0x3c   : > { %265 = vadd.xlane.f32.xlu0 %v264_v22 }
  0x3d   : > { %262 = vadd.xlane.f32.xlu1 %v261_v23 }
  0x9f   : > { %v284_v24 = vpop.xlane.xlu0 %283 }
  0xa0   : > { %v292_v25 = vmul.f32 0.00390625, %v284_v24  ;;  %v278_v26 = vpop.xlane.xlu1 %277  ;;  %v332_v24 = vld [vmem:[%s1313_s4 + $0x20] sm:$0xff] }
  0xa1   : > { %v272_v27 = vpop.xlane.xlu2 %271  ;;  %v290_v31 = vmul.f32 0.00390625, %v278_v26  ;;  %v335_v26 = vld [vmem:[%s1313_s4 + $0x38] sm:$0xff] }
  0xa2   : > { %307 = vmatpush.msra.mxu0 %v292_v25  ;;  %v288_v34 = vmul.f32 0.00390625, %v272_v27  ;;  %v330_v25 = vld [vmem:[%s1313_s4 + $0x10] sm:$0xff] }
  0xa7   : > { %v281_v28 = vpop.xlane.xlu0 %280 }
  0xa8   : > { %v291_v29 = vmul.f32 0.00390625, %v281_v28  ;;  %v275_v30 = vpop.xlane.xlu1 %274 }
  0xa9   : > { %v289_v32 = vmul.f32 0.00390625, %v275_v30  ;;  %v269_v33 = vpop.xlane.xlu2 %268 }
  0xaa   : > { %308 = vmatpush.msra.mxu0 %v291_v29  ;;  %v287_v35 = vmul.f32 0.00390625, %v269_v33 }
  0xac   : > { %309 = vmatpush.msra.mxu0 %v290_v31 }
  0xae   : > { %310 = vmatpush.msra.mxu0 %v289_v32 }
  0xaf   : > { %v266_v36 = vpop.xlane.xlu0 %265 }
  0xb0   : > { %311 = vmatpush.msra.mxu0 %v288_v34  ;;  %v286_v37 = vmul.f32 0.00390625, %v266_v36  ;;  %v263_v38 = vpop.xlane.xlu1 %262 }
  0xb1   : > { %v285_v39 = vmul.f32 0.00390625, %v263_v38 }
  0xb2   : > { %312 = vmatpush.msra.mxu0 %v287_v35 }
  0xb4   : > { %313 = vmatpush.msra.mxu0 %v286_v37 }
  0xb6   : > { %314 = vmatpush.msra.mxu0 %v285_v39 }
  0xb7   : > { %724 = vmatmul.msk.f32.vlgmr.msra.gmra.mxu0 %vm295_vm0, %v293_v40 }
 0x134   : > { %v316_v42 = vpop.f32.mrf.mxu0 }
 0x135   : > { %v317_v43 = vadd.f32 %v316_v42, %v294_v41  ;;  %v333_v42 = vld [vmem:[%s1313_s4 + $0x28] sm:$0xff] }
 0x137   : > { %v319_v44 = vmax.f32 %v317_v43, 0.0 }
 0x139   : > { %376 = vmatpush.msra.mxu1 %v319_v44  ;;  %748 = vmatpush.msra.mxu2 %v319_v44 }
 0x13a   : > { %749 = vmatpush.msra.mxu3 %v319_v44  ;;  %725 = vmatmul.msk.f32.vlgmr.msra.gmra.mxu1 %vm336_vm1, %v320_v45 }
 0x13b   : > { %728 = vmatmul.msk.f32.vlgmr.msra.gmra.mxu2 %vm336_vm1, %v323_v46  ;;  %731 = vmatmul.msk.f32.vlgmr.msra.gmra.mxu3 %vm336_vm1, %v326_v47 }
 0x142   : > { %726 = vmatmul.msk.f32.gmra.mxu1 %vm336_vm1, %v321_v48 }
 0x143   : > { %729 = vmatmul.msk.f32.gmra.mxu2 %vm336_vm1, %v324_v49  ;;  %732 = vmatmul.msk.f32.gmra.mxu3 %vm336_vm1, %v327_v50 }
 0x14a   : > { %727 = vmatmul.msk.f32.gmra.mxu1 %vm336_vm1, %v322_v51 }
 0x14b   : > { %730 = vmatmul.msk.f32.gmra.mxu2 %vm336_vm1, %v325_v52 }
 0x1b7   : > { %v378_v54 = vpop.f32.mrf.mxu1 }
 0x1b8   : > { %v379_v56 = vadd.f32 %v378_v54, %v328_v53 }
 0x1ba   : > { %v733_v57 = vmul.f32 -1.442695, %v379_v56 }
 0x1bc   : > { %804 = vpow2.f32 %v733_v57 }
 0x1be   : > { %v387_v61 = vpop.f32.mrf.mxu2  ;;  %v396_v62 = vpop.f32.mrf.mxu3 }
 0x1bf   : > { %v388_v63 = vadd.f32 %v387_v61, %v331_v58  ;;  %v381_v3 = vpop.f32.mrf.mxu1  ;;  %v397_v5 = vadd.f32 %v396_v62, %v334_v59 }
 0x1c0   : > { %v382_v8 = vadd.f32 %v381_v3, %v329_v60 }
 0x1c1   : > { %v736_v15 = vmul.f32 -1.442695, %v388_v63  ;;  %v739_v22 = vmul.f32 -1.442695, %v397_v5 }
 0x1c2   : > { %v805_v16 = vpop.eup %804  ;;  %v734_v17 = vmul.f32 -1.442695, %v382_v8 }
 0x1c3   : > { %v426_v23 = vadd.f32 1.0, %v805_v16  ;;  %806 = vpow2.f32 %v736_v15 }
 0x1c4   : > { %808 = vpow2.f32 %v734_v17 }
 0x1c5   : > { %810 = vrcp.f32 %v426_v23  ;;  %v445_v48 = vand.u32 2147483648, %v426_v23  ;;  %v443_v50 = vand.u32 2147483647, %v426_v23  ;;  %vm439_vm3 = vweird.f32 %v426_v23 }
 0x1c6   : > { %812 = vpow2.f32 %v739_v22  ;;  %v390_v27 = vpop.f32.mrf.mxu2  ;;  %v399_v28 = vpop.f32.mrf.mxu3 }
 0x1c7   : > { %v391_v29 = vadd.f32 %v390_v27, %v332_v24  ;;  %v384_v30 = vpop.f32.mrf.mxu1  ;;  %v400_v32 = vadd.f32 %v399_v28, %v335_v26  ;;  %v446_v57 = vor.u32 1.1754944e-38, %v445_v48  ;;  %vm444_vm5 = vcmp.eq.f32.partialorder %v443_v50, 8.507059e+37 }
 0x1c8   : > { %v385_v31 = vadd.f32 %v384_v30, %v330_v25 }
 0x1c9   : > { %v807_v33 = vpop.eup %806  ;;  %v737_v34 = vmul.f32 -1.442695, %v391_v29  ;;  %v740_v41 = vmul.f32 -1.442695, %v400_v32 }
 0x1ca   : > { %v809_v35 = vpop.eup %808  ;;  %v1172_v36 = vadd.f32 1.0, %v807_v33  ;;  %v735_v37 = vmul.f32 -1.442695, %v385_v31 }
 0x1cb   : > { %v811_v38 = vpop.eup %810  ;;  %v1174_v39 = vadd.f32 1.0, %v809_v35  ;;  %814 = vpow2.f32 %v737_v34 }
 0x1cc   : > { %v813_v40 = vpop.eup %812  ;;  %816 = vrcp.f32 %v1172_v36  ;;  %v435_v43 = vmul.f32 %v811_v38, %v426_v23  ;;  %vm440_vm2 = vweird.f32 %v811_v38  ;;  %v490_v16 = vand.u32 2147483648, %v1172_v36 }
 0x1cd   : > { %818 = vrcp.f32 %v1174_v39  ;;  %v1181_v44 = vadd.f32 1.0, %v813_v40  ;;  %vm441_vm4 = vmor %vm439_vm3, %vm440_vm2  ;;  %v460_v15 = vand.u32 2147483648, %v1174_v39  ;;  %v458_v25 = vand.u32 2147483647, %v1174_v39 }
 0x1ce   : > { %820 = vpow2.f32 %v735_v37  ;;  %v393_v45 = vpop.f32.mrf.mxu2  ;;  %v436_v46 = vsub.f32 1.0, %v435_v43  ;;  %v488_v26 = vand.u32 2147483647, %v1172_v36  ;;  %vm454_vm8 = vweird.f32 %v1174_v39 }
 0x1cf   : > { %v394_v47 = vadd.f32 %v393_v45, %v333_v42  ;;  %822 = vpow2.f32 %v740_v41  ;;  %vm484_vm9 = vweird.f32 %v1172_v36  ;;  %v461_v32 = vor.u32 1.1754944e-38, %v460_v15 }
 0x1d0   : > { %v437_v49 = vmul.f32 %v811_v38, %v436_v46  ;;  %824 = vrcp.f32 %v1181_v44  ;;  %v491_v35 = vor.u32 1.1754944e-38, %v490_v16  ;;  %vm459_vm12 = vcmp.eq.f32.partialorder %v458_v25, 8.507059e+37 }
 0x1d1   : > { %v815_v51 = vpop.eup %814  ;;  %v738_v52 = vmul.f32 -1.442695, %v394_v47  ;;  %vm489_vm13 = vcmp.eq.f32.partialorder %v488_v26, 8.507059e+37  ;;  %vm529_vm0 = vweird.f32 %v1181_v44  ;;  %v533_v15 = vand.u32 2147483647, %v1181_v44 }
 0x1d2   : > { %v817_v53 = vpop.eup %816  ;;  %v1184_v54 = vadd.f32 1.0, %v815_v51  ;;  %v438_v55 = vadd.f32 %v811_v38, %v437_v49 }
 0x1d3   : > { %v819_v56 = vpop.eup %818  ;;  %826 = vpow2.f32 %v738_v52  ;;  %v480_v58 = vmul.f32 %v817_v53, %v1172_v36  ;;  %vm485_vm6 = vweird.f32 %v817_v53 }
 0x1d4   : > { %v821_v59 = vpop.eup %820  ;;  %828 = vrcp.f32 %v1184_v54  ;;  %v442_v60 = vsel %vm441_vm4, %v811_v38, %v438_v55  ;;  %v450_v61 = vmul.f32 %v819_v56, %v1174_v39  ;;  %vm455_vm7 = vweird.f32 %v819_v56  ;;  %vm486_vm10 = vmor %vm484_vm9, %vm485_vm6 }
 0x1d5   : > { %v1189_v62 = vadd.f32 1.0, %v821_v59  ;;  %v447_v63 = vsel %vm444_vm5, %v446_v57, %v442_v60  ;;  %v481_v3 = vsub.f32 1.0, %v480_v58  ;;  %v823_v5 = vpop.eup %822  ;;  %vm456_vm11 = vmor %vm454_vm8, %vm455_vm7  ;;  %v505_v46 = vand.u32 2147483648, %v1184_v54 }
 0x1d6   : > { %556 = vperm.xlu2 %801, %v447_v63   ;;  %v451_v8 = vsub.f32 1.0, %v450_v61  ;;  %v1193_v17 = vpop.eup %824  ;;  %v1196_v22 = vadd.f32 1.0, %v823_v5  ;;  %v503_v48 = vand.u32 2147483647, %v1184_v54  ;;  %vm499_vm15 = vweird.f32 %v1184_v54 }
 0x1d7   : > { %830 = vrcp.f32 %v1189_v62  ;;  %v482_v23 = vmul.f32 %v817_v53, %v481_v3  ;;  %v525_v33 = vmul.f32 %v1193_v17, %v1181_v44  ;;  %v475_v50 = vand.u32 2147483648, %v1189_v62 }
 0x1d8   : > { %v452_v24 = vmul.f32 %v819_v56, %v451_v8  ;;  %832 = vrcp.f32 %v1196_v22  ;;  %v473_v55 = vand.u32 2147483647, %v1189_v62  ;;  %vm469_vm3 = vweird.f32 %v1189_v62 }
 0x1d9   : > { %v827_v27 = vpop.eup %826  ;;  %v483_v28 = vadd.f32 %v817_v53, %v482_v23  ;;  %v526_v43 = vsub.f32 1.0, %v525_v33  ;;  %v506_v58 = vor.u32 1.1754944e-38, %v505_v46  ;;  %vm504_vm4 = vcmp.eq.f32.partialorder %v503_v48, 8.507059e+37 }
 0x1da   : > { %v829_v29 = vpop.eup %828  ;;  %v1202_v30 = vadd.f32 1.0, %v827_v27  ;;  %v453_v31 = vadd.f32 %v819_v56, %v452_v24  ;;  %vm530_vm5 = vweird.f32 %v1193_v17  ;;  %v476_v61 = vor.u32 1.1754944e-38, %v475_v50 }
 0x1db   : > { %v487_v34 = vsel %vm486_vm10, %v817_v53, %v483_v28  ;;  %v495_v37 = vmul.f32 %v829_v29, %v1184_v54  ;;  %vm500_vm14 = vweird.f32 %v829_v29  ;;  %v535_v5 = vand.u32 2147483648, %v1181_v44  ;;  %vm1226_vm8 = vmor %vm529_vm0, %vm530_vm5 }
 0x1dc   : > { %834 = vrcp.f32 %v1202_v30  ;;  %v457_v38 = vsel %vm456_vm11, %v819_v56, %v453_v31  ;;  %v492_v40 = vsel %vm489_vm13, %v491_v35, %v487_v34  ;;  %vm501_vm2 = vmor %vm499_vm15, %vm500_vm14  ;;  %v527_v56 = vmul.f32 %v1193_v17, %v526_v43 }
 0x1dd   : > { %v831_v36 = vpop.eup %830  ;;  %v462_v39 = vsel %vm459_vm12, %v461_v32, %v457_v38  ;;  %v496_v41 = vsub.f32 1.0, %v495_v37  ;;  %vm474_vm7 = vcmp.eq.f32.partialorder %v473_v55, 8.507059e+37  ;;  %v520_v27 = vand.u32 2147483648, %v1202_v30 }
 0x1de   : > { %561 = vperm.xlu0 %802, %v462_v39   ;;  %571 = vperm.xlu2 %801, %v492_v40   ;;  %v465_v42 = vmul.f32 %v831_v36, %v1189_v62  ;;  %v833_v49 = vpop.eup %832  ;;  %vm470_vm1 = vweird.f32 %v831_v36  ;;  %v528_v62 = vadd.f32 %v1193_v17, %v527_v56  ;;  %v536_v28 = vor.u32 1.1754944e-38, %v535_v5 }
 0x1df   : > { %v497_v45 = vmul.f32 %v829_v29, %v496_v41  ;;  %v540_v54 = vmul.f32 %v833_v49, %v1196_v22  ;;  %vm471_vm6 = vmor %vm469_vm3, %vm470_vm1  ;;  %vm514_vm10 = vweird.f32 %v1202_v30  ;;  %vm534_vm11 = vcmp.eq.f32.partialorder %v533_v15, 8.507059e+37 }
 0x1e0   : > { %v466_v47 = vsub.f32 1.0, %v465_v42  ;;  %v532_v31 = vsel %vm1226_vm8, %v1193_v17, %v528_v62  ;;  %v521_v33 = vor.u32 1.1754944e-38, %v520_v27  ;;  %vm544_vm14 = vweird.f32 %v1196_v22 }
 0x1e1   : > { %v498_v51 = vadd.f32 %v829_v29, %v497_v45  ;;  %v541_v25 = vsub.f32 1.0, %v540_v54  ;;  %v537_v34 = vsel %vm534_vm11, %v536_v28, %v532_v31  ;;  %vm545_vm15 = vweird.f32 %v833_v49 }
 0x1e2   : > { %v835_v52 = vpop.eup %834  ;;  %v467_v53 = vmul.f32 %v831_v36, %v466_v47  ;;  %v550_v37 = vand.u32 2147483648, %v1196_v22  ;;  %v548_v38 = vand.u32 2147483647, %v1196_v22  ;;  %vm546_vm0 = vmor %vm544_vm14, %vm545_vm15 }
 0x1e3   : > { %v502_v57 = vsel %vm501_vm2, %v829_v29, %v498_v51  ;;  %v510_v59 = vmul.f32 %v835_v52, %v1202_v30  ;;  %vm515_vm9 = vweird.f32 %v835_v52  ;;  %v518_v29 = vand.u32 2147483647, %v1202_v30 }
 0x1e4   : > { %v468_v60 = vadd.f32 %v831_v36, %v467_v53  ;;  %v507_v63 = vsel %vm504_vm4, %v506_v58, %v502_v57  ;;  %vm516_vm12 = vmor %vm514_vm10, %vm515_vm9  ;;  %v542_v32 = vmul.f32 %v833_v49, %v541_v25  ;;  %v551_v17 = vor.u32 1.1754944e-38, %v550_v37 }
 0x1e5   : > { %v511_v3 = vsub.f32 1.0, %v510_v59  ;;  %vm519_vm13 = vcmp.eq.f32.partialorder %v518_v29, 8.507059e+37  ;;  %vm549_vm1 = vcmp.eq.f32.partialorder %v548_v38, 8.507059e+37 }
 0x1e6   : > { %v472_v8 = vsel %vm471_vm6, %v831_v36, %v468_v60  ;;  %576 = vperm.xlu2 %801, %v507_v63   ;;  %v543_v30 = vadd.f32 %v833_v49, %v542_v32 }
 0x1e7   : > { %v477_v16 = vsel %vm474_vm7, %v476_v61, %v472_v8  ;;  %v512_v23 = vmul.f32 %v835_v52, %v511_v3 }
 0x1e8   : > { %566 = vperm.xlu1 %803, %v477_v16   ;;  %v547_v36 = vsel %vm546_vm0, %v833_v49, %v543_v30 }
 0x1e9   : > { %v513_v26 = vadd.f32 %v835_v52, %v512_v23  ;;  %v552_v39 = vsel %vm549_vm1, %v551_v17, %v547_v36 }
 0x1eb   : > { %v517_v44 = vsel %vm516_vm12, %v835_v52, %v513_v26 }
 0x1ec   : > { %v522_v35 = vsel %vm519_vm13, %v521_v33, %v517_v44 }
 0x1ee   : > { %586 = vperm.xlu2 %801, %v537_v34  }
 0x1f0   : > { %581 = vperm.xlu1 %803, %v522_v35  }
 0x1f8   : > { %591 = vperm.xlu1 %803, %v552_v39  }
 0x230   : > { %v557_v40 = vpop.permute.xlu2 %556 }
 0x231   : > { %v594_v41 = vmul.f32 %v557_v40, %v1105_v20  ;;  %v595_v42 = vmul.f32 %v557_v40, %v1107_v21 }
 0x233   : > { %610 = vst [vmem:[%s1243_s9] sm:$0xff] %v594_v41 }
 0x234   : > { %611 = vst [vmem:[%s1243_s9 + $0x8] sm:$0xff] %v595_v42 }
 0x238   : > { %v572_v22 = vpop.permute.xlu2 %571 }
 0x239   : > { %v600_v43 = vmul.f32 %v572_v22, %v1077_v6  ;;  %v601_v20 = vmul.f32 %v572_v22, %v1079_v7 }
 0x23b   : > { %616 = vst [vmem:[%s1243_s9 + $0x30] sm:$0xff] %v600_v43 }
 0x23c   : > { %617 = vst [vmem:[%s1243_s9 + $0x38] sm:$0xff] %v601_v20 }
 0x240   : > { %v577_v21 = vpop.permute.xlu2 %576 }
 0x241   : > { %v602_v45 = vmul.f32 %v577_v21, %v1087_v11  ;;  %v603_v46 = vmul.f32 %v577_v21, %v1089_v12 }
 0x243   : > { %618 = vst [vmem:[%s1243_s9 + $0x40] sm:$0xff] %v602_v45 }
 0x244   : > { %619 = vst [vmem:[%s1243_s9 + $0x48] sm:$0xff] %v603_v46 }
 0x248   : > { %v587_v47 = vpop.permute.xlu2 %586 }
 0x249   : > { %v606_v48 = vmul.f32 %v587_v47, %v1083_v9  ;;  %v607_v6 = vmul.f32 %v587_v47, %v1085_v10 }
 0x24b   : > { %622 = vst [vmem:[%s1243_s9 + $0x60] sm:$0xff] %v606_v48 }
 0x24c   : > { %623 = vst [vmem:[%s1243_s9 + $0x68] sm:$0xff] %v607_v6 }
 0x250   : > { %v562_v7 = vpop.permute.xlu0 %561 }
 0x251   : > { %v596_v49 = vmul.f32 %v562_v7, %v1101_v18  ;;  %v597_v11 = vmul.f32 %v562_v7, %v1103_v19 }
 0x253   : > { %612 = vst [vmem:[%s1243_s9 + $0x10] sm:$0xff] %v596_v49 }
 0x254   : > { %613 = vst [vmem:[%s1243_s9 + $0x18] sm:$0xff] %v597_v11 }
 0x25a   : > { %v567_v12 = vpop.permute.xlu1 %566 }
 0x25b   : > { %v598_v50 = vmul.f32 %v567_v12, %v1091_v13  ;;  %v599_v51 = vmul.f32 %v567_v12, %v1093_v14 }
 0x25d   : > { %614 = vst [vmem:[%s1243_s9 + $0x20] sm:$0xff] %v598_v50 }
 0x25e   : > { %615 = vst [vmem:[%s1243_s9 + $0x28] sm:$0xff] %v599_v51 }
 0x262   : > { %v582_v9 = vpop.permute.xlu1 %581 }
 0x263   : > { %v604_v10 = vmul.f32 %v582_v9, %v1069_v2  ;;  %v605_v18 = vmul.f32 %v582_v9, %v1073_v4 }
 0x265   : > { %620 = vst [vmem:[%s1243_s9 + $0x50] sm:$0xff] %v604_v10 }
 0x266   : > { %621 = vst [vmem:[%s1243_s9 + $0x58] sm:$0xff] %v605_v18 }
 0x26a   : > { %v592_v13 = vpop.permute.xlu1 %591 }
 0x26b   : > { %v608_v14 = vmul.f32 %v592_v13, %v1065_v0  ;;  %v609_v19 = vmul.f32 %v592_v13, %v1067_v1 }
 0x26d   : > { %624 = vst [vmem:[%s1243_s9 + $0x70] sm:$0xff] %v608_v14 }
 0x26e   : > { %625 = vst [vmem:[%s1243_s9 + $0x78] sm:$0xff] %v609_v19 }
 0x26f   : > { %893 = shalt.err (!%p890_p4)
}
 0x270   : > { %s937_s12 = smov 256   ;;  %s938_s28 = smov 16  }
 0x271   : > { %752 = dma.vmem_to_hbm [thread:$0]  (%p1019_p11), %s640_s23, 2048, %s642_s25, %s627_s22, %s937_s12, %s937_s12, %s938_s28  }
 0x272 PF: > { %s656_s9 = sand.u32 1, %s920_s18   ;;  %p1322_p7 = scmp.ge.s32.totalorder %s932_s21, 2 }
 0x273   : > { %s657_s14 = scalar_lea.sflag [#allocation4], %s656_s9 }
 0x274   : > { %p759_p5 = pnand %p1322_p7, %p1023_p12 }
 0x276   : > { %p760_p8 = pneg %p759_p5 }
 0x278   : > { %915 = dma.done.wait (%p760_p8), %s657_s14, 2048  }
 0x279   : > { %917 = vsyncadd (%p760_p8), %s657_s14, 4294965248  ;;  %p18_p10 = scmp.ge.s32.totalorder %s994_s24, 4   ;;  %s1323_s18 = smov %s924_s19 }
 0x27a   : > { %s1324_s19 = smov %s928_s20  ;;  %s1325_s20 = smov %s1006_s27 }
 0x27b   : > { %s1326_s21 = smov %s994_s24  ;;  %20 = sbr.rel (!%p18_p10) target bundleno = 5 (0x5), region = 85 }
 0x280   :  { %663 = vsyncpa [#allocation3], 1 }
 0x281   :  { %665 = vsyncpa [#allocation3 + $0x1], 1 }
 0x282   :  { %666 = vsyncpa [#allocation4], 1 }
 0x283   :  { %668 = vsyncpa [#allocation4 + $0x1], 1 }

</bundles_post_ra>
